<compile_context>
chip_gen: v6e
topology: v6e:2x2x1
jax: 0.10.0
libtpu: 0.0.40
codegen_flags: <defaults>
</compile_context>

<pallas_src>
import functools

import jax
import jax.numpy as jnp
from jax import lax
from jax.experimental import pallas as pl
from jax.experimental.pallas import tpu as pltpu


def _round_up(x, m):
    return (x + m - 1) // m * m


# ----------------------------- Pallas kernel --------------------------------
def _fused_ed_kernel(x_ref, we_ref, be_ref, wd_ref, bd_ref, o_ref):
    # encoder: (tm, K) @ (K, Hh) on the MXU, bf16 operands / f32 accumulation.
    enc = jnp.dot(x_ref[...], we_ref[...], preferred_element_type=jnp.float32)
    # bias + ReLU in the f32 accumulator (VPU), stays in VMEM.
    enc = jnp.maximum(enc + be_ref[...], 0.0)
    # decoder (1x1 conv) as a fused epilogue matmul: (tm, Hh) @ (Hh, Ncls).
    cla = jnp.dot(enc.astype(wd_ref.dtype), wd_ref[...],
                  preferred_element_type=jnp.float32)
    o_ref[...] = (cla + bd_ref[...]).astype(o_ref.dtype)


def fused_encoder_decoder(patches, w_enc, b_enc, w_dec, b_dec, *, tm_max=512):
    """relu(patches @ w_enc + b_enc) @ w_dec + b_dec in a single pallas_call.

    Operands must be pre-padded: K / hidden / class dims multiples of 128 and
    the row count a multiple of the chosen row tile.
    """
    M, K = patches.shape
    Kw, Hh = w_enc.shape
    Hw, Nc = w_dec.shape
    assert K == Kw and Hh == Hw
    assert b_enc.shape == (1, Hh) and b_dec.shape == (1, Nc)

    tm = min(tm_max, M)
    assert tm % 8 == 0 and M % tm == 0, (M, tm)

    return pl.pallas_call(
        _fused_ed_kernel,
        out_shape=jax.ShapeDtypeStruct((M, Nc), jnp.float32),
        grid=(M // tm,),
        in_specs=[
            pl.BlockSpec((tm, K), lambda i: (i, 0)),     # patch rows (tiled)
            pl.BlockSpec((K, Hh), lambda i: (0, 0)),     # encoder weights
            pl.BlockSpec((1, Hh), lambda i: (0, 0)),     # encoder bias
            pl.BlockSpec((Hh, Nc), lambda i: (0, 0)),    # decoder weights
            pl.BlockSpec((1, Nc), lambda i: (0, 0)),     # decoder bias
        ],
        out_specs=pl.BlockSpec((tm, Nc), lambda i: (i, 0)),
        compiler_params=pltpu.CompilerParams(
            dimension_semantics=("parallel",),           # megacore sharding
            vmem_limit_bytes=32 * 1024 * 1024,           # safe on v5e/v6e/v7x
        ),
    )(patches, w_enc, b_enc, w_dec, b_dec)


# ------------------------------- glue (JAX) ---------------------------------
def _im2col_3x3_s2_p1(x_nhwc):
    """im2col for a 3x3 / stride 2 / pad 1 conv. Returns (N*H2*W2, 9*C)."""
    # TODO(synk): for large resolutions fold this into the kernel as 9 shifted
    # accumulated matmuls to avoid the 9x HBM blow-up of the input.
    N, H, W, C = x_nhwc.shape
    H2 = (H + 2 - 3) // 2 + 1
    W2 = (W + 2 - 3) // 2 + 1
    xp = jnp.pad(x_nhwc, ((0, 0), (1, 1), (1, 1), (0, 0)))
    cols = []
    for dy in range(3):
        for dx in range(3):
            cols.append(xp[:, dy::2, dx::2, :][:, :H2, :W2, :])
    patches = jnp.concatenate(cols, axis=-1)  # (N, H2, W2, 9*C)
    return patches.reshape(N * H2 * W2, 9 * C), (N, H2, W2)


def ed_model_forward(params, x_nchw, reverse=False, *, tm_max=512):
    """ED_model.forward: x -> encoder -> decoder(..., H, W, reverse)."""
    N, C, H, W = x_nchw.shape
    x = jnp.transpose(x_nchw, (0, 2, 3, 1))  # NHWC (channels on lanes)

    patches, (n, h2, w2) = _im2col_3x3_s2_p1(x)
    M, K = patches.shape
    hidden = params["enc_b"].shape[0]
    num_classes = params["dec_b"].shape[0]

    # --- pad to lane-/tile-friendly sizes (zeros are exact no-ops) ---
    K_pad = _round_up(K, 128)
    Hh_pad = _round_up(hidden, 128)
    Nc_pad = _round_up(num_classes, 128)
    tm = min(tm_max, _round_up(M, 8))
    M_pad = _round_up(M, tm)

    patches_p = jnp.pad(patches.astype(jnp.bfloat16),
                        ((0, M_pad - M), (0, K_pad - K)))
    w_enc = params["enc_w"].reshape(K, hidden)            # HWIO -> (9*C, hid)
    w_enc_p = jnp.pad(w_enc.astype(jnp.bfloat16),
                      ((0, K_pad - K), (0, Hh_pad - hidden)))
    b_enc_p = jnp.pad(params["enc_b"].astype(jnp.float32),
                      (0, Hh_pad - hidden)).reshape(1, Hh_pad)
    w_dec_p = jnp.pad(params["dec_w"].astype(jnp.bfloat16),
                      ((0, Hh_pad - hidden), (0, Nc_pad - num_classes)))
    b_dec_p = jnp.pad(params["dec_b"].astype(jnp.float32),
                      (0, Nc_pad - num_classes)).reshape(1, Nc_pad)

    # --- fused encoder + decoder matmuls (single HBM pass over patches) ---
    cla = fused_encoder_decoder(patches_p, w_enc_p, b_enc_p, w_dec_p, b_dec_p,
                                tm_max=tm)
    cla = cla[:M, :num_classes].reshape(n, h2, w2, num_classes)

    # --- nearest-neighbour upsample back to (H, W) ---
    # TODO(synk): could be fused into the kernel's output index_map writeback.
    sh, sw = H // h2, W // w2
    cla = jnp.broadcast_to(
        cla[:, :, None, :, None, :], (n, h2, sh, w2, sw, num_classes)
    ).reshape(n, h2 * sh, w2 * sw, num_classes)

    # `reverse` is a gradient-reversal flag -> identity in forward.
    del reverse

    return jnp.transpose(cla, (0, 3, 1, 2))  # NCHW: (N, classes, H, W)


# ---------------------------- reference (pure JAX) ---------------------------
def _reference_forward(params, x_nchw):
    N, C, H, W = x_nchw.shape
    x = jnp.transpose(x_nchw, (0, 2, 3, 1))
    enc = lax.conv_general_dilated(
        x, params["enc_w"], window_strides=(2, 2), padding=((1, 1), (1, 1)),
        dimension_numbers=("NHWC", "HWIO", "NHWC"))
    enc = jax.nn.relu(enc + params["enc_b"])
    cla = jnp.einsum("nhwk,kc->nhwc", enc, params["dec_w"]) + params["dec_b"]
    h2, w2 = cla.shape[1], cla.shape[2]
    cla = jnp.repeat(jnp.repeat(cla, H // h2, axis=1), W // w2, axis=2)
    return jnp.transpose(cla, (0, 3, 1, 2))


# ---------------------------------- main -------------------------------------
if __name__ == "__main__":
    key = jax.random.PRNGKey(0)
    k_x, k_ew, k_eb, k_dw, k_db = jax.random.split(key, 5)

    N, C, H, W = 2, 4, 16, 16
    hidden, num_classes = 32, 8

    x = jax.random.normal(k_x, (N, C, H, W), dtype=jnp.float32)
    params = {
        # encoder Conv2d(C, hidden, 3, stride=2, pad=1) weights in HWIO layout
        "enc_w": 0.1 * jax.random.normal(k_ew, (3, 3, C, hidden), jnp.float32),
        "enc_b": 0.1 * jax.random.normal(k_eb, (hidden,), jnp.float32),
        # decoder Conv2d(hidden, num_classes, 1) weights as (hidden, classes)
        "dec_w": 0.1 * jax.random.normal(k_dw, (hidden, num_classes), jnp.float32),
        "dec_b": 0.1 * jax.random.normal(k_db, (num_classes,), jnp.float32),
    }

    out = ed_model_forward(params, x, reverse=False)
    out = jax.block_until_ready(out)

    ref = jax.block_until_ready(_reference_forward(params, x))
    assert out.shape == (N, num_classes, H, W), out.shape
    # bf16 MXU operands vs f32 reference -> relaxed tolerance.
    assert jnp.allclose(out, ref, atol=2e-2, rtol=2e-2), "mismatch vs reference"

    print("KERNEL_OK")
</pallas_src>

<mosaic_0001>
module attributes {stable_mosaic.version = 11 : i64} {
  func.func @_fused_ed_kernel(%arg0: i32, %arg1: memref<128x128xbf16, #tpu.memory_space<vmem>>, %arg2: memref<128x128xbf16, #tpu.memory_space<vmem>>, %arg3: memref<1x128xf32, #tpu.memory_space<vmem>>, %arg4: memref<128x128xbf16, #tpu.memory_space<vmem>>, %arg5: memref<1x128xf32, #tpu.memory_space<vmem>>, %arg6: memref<128x128xf32, #tpu.memory_space<vmem>>) attributes {dimension_semantics = [#tpu.dimension_semantics<parallel>], iteration_bounds = array<i64: 1>, scalar_prefetch = 0 : i64, scratch_operands = 0 : i64, tpu.core_type = #tpu.core_type<tc>, window_params = [{transform_indices = @transform_0, window_bounds = array<i64: 128, 128>}, {pipeline_mode = #tpu.pipeline_mode<synchronous>, transform_indices = @transform_1, window_bounds = array<i64: 128, 128>}, {pipeline_mode = #tpu.pipeline_mode<synchronous>, transform_indices = @transform_2, window_bounds = array<i64: 1, 128>}, {pipeline_mode = #tpu.pipeline_mode<synchronous>, transform_indices = @transform_3, window_bounds = array<i64: 128, 128>}, {pipeline_mode = #tpu.pipeline_mode<synchronous>, transform_indices = @transform_4, window_bounds = array<i64: 1, 128>}, {transform_indices = @transform_5, window_bounds = array<i64: 128, 128>}]} {
    %c0 = arith.constant 0 : index
    %c0_0 = arith.constant 0 : index
    %0 = vector.load %arg1[%c0, %c0_0] : memref<128x128xbf16, #tpu.memory_space<vmem>>, vector<128x128xbf16>
    %c0_1 = arith.constant 0 : index
    %c0_2 = arith.constant 0 : index
    %1 = vector.load %arg2[%c0_1, %c0_2] : memref<128x128xbf16, #tpu.memory_space<vmem>>, vector<128x128xbf16>
    %cst = arith.constant dense<0.000000e+00> : vector<128x128xf32>
    %2 = tpu.matmul %0, %1, %cst {dimension_numbers = #tpu.dot_dimension_numbers<[1], [0], [0], [1], [0, 0, 1, 1], [], []>} : vector<128x128xbf16>, vector<128x128xbf16>, vector<128x128xf32> -> vector<128x128xf32>
    %c0_3 = arith.constant 0 : index
    %c0_4 = arith.constant 0 : index
    %3 = vector.load %arg3[%c0_3, %c0_4] : memref<1x128xf32, #tpu.memory_space<vmem>>, vector<1x128xf32>
    %4 = vector.broadcast %3 : vector<1x128xf32> to vector<128x128xf32>
    %5 = arith.addf %2, %4 : vector<128x128xf32>
    %cst_5 = arith.constant 0.000000e+00 : f32
    %6 = vector.broadcast %cst_5 : f32 to vector<128x128xf32>
    %7 = arith.maximumf %5, %6 : vector<128x128xf32>
    %8 = arith.truncf %7 : vector<128x128xf32> to vector<128x128xbf16>
    %c0_6 = arith.constant 0 : index
    %c0_7 = arith.constant 0 : index
    %9 = vector.load %arg4[%c0_6, %c0_7] : memref<128x128xbf16, #tpu.memory_space<vmem>>, vector<128x128xbf16>
    %cst_8 = arith.constant dense<0.000000e+00> : vector<128x128xf32>
    %10 = tpu.matmul %8, %9, %cst_8 {dimension_numbers = #tpu.dot_dimension_numbers<[1], [0], [0], [1], [0, 0, 1, 1], [], []>} : vector<128x128xbf16>, vector<128x128xbf16>, vector<128x128xf32> -> vector<128x128xf32>
    %c0_9 = arith.constant 0 : index
    %c0_10 = arith.constant 0 : index
    %11 = vector.load %arg5[%c0_9, %c0_10] : memref<1x128xf32, #tpu.memory_space<vmem>>, vector<1x128xf32>
    %12 = vector.broadcast %11 : vector<1x128xf32> to vector<128x128xf32>
    %13 = arith.addf %10, %12 : vector<128x128xf32>
    %c0_11 = arith.constant 0 : index
    %c0_12 = arith.constant 0 : index
    %14 = vector.load %arg6[%c0_11, %c0_12] : memref<128x128xf32, #tpu.memory_space<vmem>>, vector<128x128xf32>
    tpu.vector_store %arg6[%c0_11, %c0_12], %13 {strides = array<i32>} : memref<128x128xf32, #tpu.memory_space<vmem>>, vector<128x128xf32>,
    return
  }
  func.func @transform_0(%arg0: i32) -> (i32, i32) {
    %c0_i32 = arith.constant 0 : i32
    %c0_i32_0 = arith.constant 0 : i32
    return %arg0, %c0_i32 : i32, i32
  }
  func.func @transform_1(%arg0: i32) -> (i32, i32) {
    %c0_i32 = arith.constant 0 : i32
    %c0_i32_0 = arith.constant 0 : i32
    %c0_i32_1 = arith.constant 0 : i32
    return %c0_i32, %c0_i32_0 : i32, i32
  }
  func.func @transform_2(%arg0: i32) -> (i32, i32) {
    %c0_i32 = arith.constant 0 : i32
    %c0_i32_0 = arith.constant 0 : i32
    %c0_i32_1 = arith.constant 0 : i32
    return %c0_i32, %c0_i32_0 : i32, i32
  }
  func.func @transform_3(%arg0: i32) -> (i32, i32) {
    %c0_i32 = arith.constant 0 : i32
    %c0_i32_0 = arith.constant 0 : i32
    %c0_i32_1 = arith.constant 0 : i32
    return %c0_i32, %c0_i32_0 : i32, i32
  }
  func.func @transform_4(%arg0: i32) -> (i32, i32) {
    %c0_i32 = arith.constant 0 : i32
    %c0_i32_0 = arith.constant 0 : i32
    %c0_i32_1 = arith.constant 0 : i32
    return %c0_i32, %c0_i32_0 : i32, i32
  }
  func.func @transform_5(%arg0: i32) -> (i32, i32) {
    %c0_i32 = arith.constant 0 : i32
    %c0_i32_0 = arith.constant 0 : i32
    return %arg0, %c0_i32 : i32, i32
  }
}

</mosaic_0001>

<bundles_post_ra>
// kernel: tpu_custom_call.1
= control target key start
LH: loop header
LB: loop body
LE: loop exit
PB: predicated region body
PF: predicated region fallthrough
CT: control target
= control target key end

     0   :  { %10 = vsyncpa [#allocation3], 0  ;;  %s817_s0 = inlined_call_operand.hbm [shape: bf16[128,128], index: 0, kind: input, shape index: {}]   ;;  %s818_s1 = inlined_call_operand.hbm [shape: bf16[128,128], index: 1, kind: input, shape index: {}]   ;;  %s819_s2 = inlined_call_operand.vmem [shape: f32[1,128], index: 2, kind: input, shape index: {}]   ;;  %s820_s3 = inlined_call_operand.hbm [shape: bf16[128,128], index: 3, kind: input, shape index: {}]   ;;  %s821_s4 = inlined_call_operand.vmem [shape: f32[1,128], index: 4, kind: input, shape index: {}]   ;;  %s822_s5 = inlined_call_operand.hbm [shape: f32[128,128], index: 5, kind: output, shape index: {}]  }
   0x1   :  { %11 = vsyncpa [#allocation6], 0 }
   0x2   :  { %12 = vsyncpa [#allocation4], 0  ;;  %s761_s18 = smov [#allocation5]   ;;  %s762_s20 = smov [#allocation2]  }
   0x3   :  { %s30_s19 = sshll.u32 %s761_s18, 4  ;;  %s18_s21 = sshll.u32 %s762_s20, 4  ;;  %s31_s19 = int_to_ptr.vmem [resolvable:$true] %s30_s19  ;;  %s19_s21 = int_to_ptr.vmem [resolvable:$true] %s18_s21 }
   0x4   :  { %s683_s22 = scalar_lea.vmem %s31_s19, 1024  ;;  %p688_p1 = scmp.lt.s32.totalorder %s31_s19, %s31_s19 }
   0x5   :  { %p684_p0 = scmp.ne.s32.totalorder %s31_s19, %s683_s22  ;;  %p689_p2 = scmp.lt.s32.totalorder %s683_s22, %s683_s22 }
   0x7   :  { %p690_p3 = por %p689_p2, %p688_p1 }
   0x9   :  { %p691_p4 = pnand %p690_p3, %p684_p0 }
   0xb   :  { %694 = shalt.err (!%p691_p4)
}
   0xc   :  { %s763_s23 = smov 64   ;;  %s764_s24 = smov 4  }
   0xd   :  { %36 = dma.hbm_to_vmem [thread:$0]  %s818_s1, 1024, %s31_s19, [#allocation6], %s763_s23, %s763_s23, %s764_s24  }
   0xe   :  { %s703_s27 = scalar_lea.vmem %s19_s21, 1024  ;;  %p708_p6 = scmp.lt.s32.totalorder %s19_s21, %s19_s21 }
   0xf   :  { %p704_p5 = scmp.ne.s32.totalorder %s19_s21, %s703_s27  ;;  %p709_p7 = scmp.lt.s32.totalorder %s703_s27, %s703_s27 }
  0x11   :  { %p710_p8 = por %p709_p7, %p708_p6 }
  0x13   :  { %p711_p9 = pnand %p710_p8, %p704_p5 }
  0x15   :  { %714 = shalt.err (!%p711_p9)
}
  0x16   :  { %24 = dma.hbm_to_vmem [thread:$0]  %s817_s0, 1024, %s19_s21, [#allocation3], %s763_s23, %s763_s23, %s764_s24  }
  0x17   :  { %s765_s30 = smov [#allocation7]  }
  0x18   :  { %s44_s6 = sshll.u32 %s765_s30, 4  ;;  %s45_s6 = int_to_ptr.vmem [resolvable:$true] %s44_s6 }
  0x19   :  { %s723_s7 = scalar_lea.vmem %s45_s6, 1024  ;;  %p728_p11 = scmp.lt.s32.totalorder %s45_s6, %s45_s6 }
  0x1a   :  { %p724_p10 = scmp.ne.s32.totalorder %s45_s6, %s723_s7  ;;  %p729_p12 = scmp.lt.s32.totalorder %s723_s7, %s723_s7 }
  0x1c   :  { %p730_p13 = por %p729_p12, %p728_p11 }
  0x1e   :  { %p731_p0 = pnand %p730_p13, %p724_p10 }
  0x20   :  { %734 = shalt.err (!%p731_p0)
}
  0x21   :  { %50 = dma.hbm_to_vmem [thread:$0]  %s820_s3, 1024, %s45_s6, [#allocation6], %s763_s23, %s763_s23, %s764_s24  }
  0x22   :  { %755 = dma.done.wait [#allocation3], 1024  }
  0x23   :  { %756 = vsyncadd [#allocation3], 4294966272 }
  0x24   :  { %757 = dma.done.wait [#allocation6], 2048  }
  0x25   :  { %758 = vsyncadd [#allocation6], 4294965248  ;;  %v651_v0 = vld [vmem:[#allocation5 + $0x38] sm:$0xff]   ;;  %v652_v1 = vld [vmem:[#allocation5 + $0x30] sm:$0xff]  }
  0x26   :  { %579 = vmatprep.subr.bf16.mxu0 %v651_v0  ;;  %v653_v2 = vld [vmem:[#allocation5 + $0x28] sm:$0xff]   ;;  %v654_v3 = vld [vmem:[#allocation5 + $0x20] sm:$0xff]   ;;  %v655_v5 = vld [vmem:[#allocation5 + $0x18] sm:$0xff]  }
  0x27   :  { %580 = vmatpush3.bf16.msra.mxu0 %v651_v0  ;;  %v659_v4 = vld [vmem:[#allocation2] sm:$0xff]   ;;  %v656_v6 = vld [vmem:[#allocation5 + $0x10] sm:$0xff]   ;;  %v667_v7 = vld [vmem:[#allocation7 + $0x38] sm:$0xff]  }
  0x28   :  { %581 = vmatprep.subr.bf16.mxu0 %v652_v1  ;;  %595 = vmatprep.mubr.bf16.mxu0 %v659_v4  ;;  %v668_v8 = vld [vmem:[#allocation7 + $0x30] sm:$0xff]   ;;  %v657_v9 = vld [vmem:[#allocation5 + $0x8] sm:$0xff]   ;;  %v658_v11 = vld [vmem:[#allocation5] sm:$0xff]  }
  0x29   :  { %611 = vmatprep.subr.bf16.mxu1 %v667_v7  ;;  %v669_v10 = vld [vmem:[#allocation7 + $0x28] sm:$0xff]   ;;  %v670_v12 = vld [vmem:[#allocation7 + $0x20] sm:$0xff]   ;;  %v671_v13 = vld [vmem:[#allocation7 + $0x18] sm:$0xff]  }
  0x2a   :  { %612 = vmatpush3.bf16.msra.mxu1 %v667_v7  ;;  %v660_v14 = vld [vmem:[#allocation2 + $0x8] sm:$0xff]   ;;  %v661_v15 = vld [vmem:[#allocation2 + $0x10] sm:$0xff]   ;;  %v662_v16 = vld [vmem:[#allocation2 + $0x18] sm:$0xff]  }
  0x2b   :  { %582 = vmatpush3.bf16.msra.mxu0 %v652_v1  ;;  %613 = vmatprep.subr.bf16.mxu1 %v668_v8  ;;  %v663_v17 = vld [vmem:[#allocation2 + $0x20] sm:$0xff]   ;;  %v664_v18 = vld [vmem:[#allocation2 + $0x28] sm:$0xff]   ;;  %v665_v19 = vld [vmem:[#allocation2 + $0x30] sm:$0xff]  }
  0x2c   :  { %583 = vmatprep.subr.bf16.mxu0 %v653_v2  ;;  %v666_v20 = vld [vmem:[#allocation2 + $0x38] sm:$0xff]   ;;  %v672_v21 = vld [vmem:[#allocation7 + $0x10] sm:$0xff]   ;;  %v673_v22 = vld [vmem:[#allocation7 + $0x8] sm:$0xff]  }
  0x2d   :  { %v674_v23 = vld [vmem:[#allocation7] sm:$0xff]  }
  0x2e   :  { %614 = vmatpush3.bf16.msra.mxu1 %v668_v8  ;;  %v521_v26 = vld [vmem:[%s819_s2] ss:$0 sm:$0xff] }
  0x2f   :  { %584 = vmatpush3.bf16.msra.mxu0 %v653_v2  ;;  %615 = vmatprep.subr.bf16.mxu1 %v669_v10 }
  0x30   :  { %585 = vmatprep.subr.bf16.mxu0 %v654_v3 }
  0x32   :  { %616 = vmatpush3.bf16.msra.mxu1 %v669_v10 }
  0x33   :  { %586 = vmatpush3.bf16.msra.mxu0 %v654_v3  ;;  %617 = vmatprep.subr.bf16.mxu1 %v670_v12 }
  0x34   :  { %587 = vmatprep.subr.bf16.mxu0 %v655_v5 }
  0x36   :  { %618 = vmatpush3.bf16.msra.mxu1 %v670_v12 }
  0x37   :  { %588 = vmatpush3.bf16.msra.mxu0 %v655_v5  ;;  %619 = vmatprep.subr.bf16.mxu1 %v671_v13 }
  0x38   :  { %589 = vmatprep.subr.bf16.mxu0 %v656_v6 }
  0x3a   :  { %620 = vmatpush3.bf16.msra.mxu1 %v671_v13 }
  0x3b   :  { %590 = vmatpush3.bf16.msra.mxu0 %v656_v6  ;;  %621 = vmatprep.subr.bf16.mxu1 %v672_v21 }
  0x3c   :  { %591 = vmatprep.subr.bf16.mxu0 %v657_v9 }
  0x3e   :  { %622 = vmatpush3.bf16.msra.mxu1 %v672_v21 }
  0x3f   :  { %592 = vmatpush3.bf16.msra.mxu0 %v657_v9  ;;  %623 = vmatprep.subr.bf16.mxu1 %v673_v22 }
  0x40   :  { %593 = vmatprep.subr.bf16.mxu0 %v658_v11 }
  0x42   :  { %624 = vmatpush3.bf16.msra.mxu1 %v673_v22 }
  0x43   :  { %594 = vmatpush3.bf16.msra.mxu0 %v658_v11  ;;  %625 = vmatprep.subr.bf16.mxu1 %v674_v23 }
  0x46   :  { %596 = vmatmul.mubr.bf16.vlgmr.msra.gmra.mxu0 %v660_v14  ;;  %626 = vmatpush3.bf16.msra.mxu1 %v674_v23 }
  0x47   :  { %599 = vmatprep.mubr.bf16.mxu0 %v661_v15 }
  0x4e   :  { %600 = vmatmul.mubr.bf16.gmra.mxu0 %v662_v16 }
  0x4f   :  { %603 = vmatprep.mubr.bf16.mxu0 %v663_v17  ;;  %v538_v17 = vld [vmem:[%s821_s4] ss:$0 sm:$0xff]  ;;  %s766_s4 = smov [#allocation8]  }
  0x50   :  { %s508_s10 = sshll.u32 %s766_s4, 4  ;;  %s509_s10 = int_to_ptr.vmem [resolvable:$true] %s508_s10 }
  0x51   :  { %s735_s11 = scalar_lea.vmem %s509_s10, 2048  ;;  %p740_p2 = scmp.lt.s32.totalorder %s509_s10, %s509_s10 }
  0x52   :  { %p736_p1 = scmp.ne.s32.totalorder %s509_s10, %s735_s11  ;;  %p741_p3 = scmp.lt.s32.totalorder %s735_s11, %s735_s11 }
  0x54   :  { %p742_p4 = por %p741_p3, %p740_p2 }
  0x56   :  { %604 = vmatmul.mubr.bf16.gmra.mxu0 %v664_v18  ;;  %p743_p5 = pnand %p742_p4, %p736_p1 }
  0x57   :  { %607 = vmatprep.mubr.bf16.mxu0 %v665_v19 }
  0x5e   :  { %608 = vmatmul.mubr.bf16.gmra.mxu0 %v666_v20 }
 0x106   :  { %v597_v24 = vpop.f32.mrf.mxu0 }
 0x107   :  { %v241_v30 = vadd.f32 %v597_v24, %v521_v26 }
 0x108   :  { %v232_v25 = vpop.f32.mrf.mxu0 }
 0x109   :  { %v233_v28 = vadd.f32 %v521_v26, %v232_v25  ;;  %v297_v37 = vmax.f32 %v241_v30, 0.0 }
 0x10a   :  { %v598_v27 = vpop.f32.mrf.mxu0 }
 0x10b   :  { %v244_v29 = vadd.f32 %v598_v27, %v521_v26  ;;  %v295_v35 = vmax.f32 %v233_v28, 0.0 }
 0x10c   :  { %v235_v31 = vpop.f32.mrf.mxu0 }
 0x10d   :  { %v236_v32 = vadd.f32 %v521_v26, %v235_v31  ;;  %v298_v33 = vmax.f32 %v244_v29, 0.0 }
 0x10e   :  { %v601_v34 = vpop.f32.mrf.mxu0 }
 0x10f   :  { %v296_v36 = vmax.f32 %v236_v32, 0.0  ;;  %v312_v40 = vpack.c.bf16 %v298_v33, %v297_v37  ;;  %v257_v44 = vadd.f32 %v601_v34, %v521_v26 }
 0x110   :  { %v248_v38 = vpop.f32.mrf.mxu0 }
 0x111   :  { %v311_v39 = vpack.c.bf16 %v296_v36, %v295_v35  ;;  %v249_v42 = vadd.f32 %v521_v26, %v248_v38  ;;  %v301_v51 = vmax.f32 %v257_v44, 0.0 }
 0x112   :  { %v602_v41 = vpop.f32.mrf.mxu0 }
 0x113   :  { %v260_v43 = vadd.f32 %v602_v41, %v521_v26  ;;  %627 = vmatprep.mubr.bf16.mxu1 %v311_v39  ;;  %v299_v49 = vmax.f32 %v249_v42, 0.0 }
 0x114   :  { %v251_v45 = vpop.f32.mrf.mxu0  ;;  %628 = vmatmul.mubr.bf16.vlgmr.msra.gmra.mxu1 %v312_v40 }
 0x115   :  { %v252_v46 = vadd.f32 %v521_v26, %v251_v45  ;;  %v302_v47 = vmax.f32 %v260_v43, 0.0 }
 0x116   :  { %v605_v48 = vpop.f32.mrf.mxu0 }
 0x117   :  { %v300_v50 = vmax.f32 %v252_v46, 0.0  ;;  %v314_v54 = vpack.c.bf16 %v302_v47, %v301_v51  ;;  %v273_v58 = vadd.f32 %v605_v48, %v521_v26 }
 0x118   :  { %v264_v52 = vpop.f32.mrf.mxu0 }
 0x119   :  { %v313_v53 = vpack.c.bf16 %v300_v50, %v299_v49  ;;  %v265_v56 = vadd.f32 %v521_v26, %v264_v52  ;;  %v305_v1 = vmax.f32 %v273_v58, 0.0 }
 0x11a   :  { %v606_v55 = vpop.f32.mrf.mxu0 }
 0x11b   :  { %v276_v57 = vadd.f32 %v606_v55, %v521_v26  ;;  %631 = vmatprep.mubr.bf16.mxu1 %v313_v53  ;;  %v303_v63 = vmax.f32 %v265_v56, 0.0 }
 0x11c   :  { %v267_v59 = vpop.f32.mrf.mxu0  ;;  %632 = vmatmul.mubr.bf16.gmra.mxu1 %v314_v54 }
 0x11d   :  { %v268_v60 = vadd.f32 %v521_v26, %v267_v59  ;;  %v306_v61 = vmax.f32 %v276_v57, 0.0 }
 0x11e   :  { %v609_v62 = vpop.f32.mrf.mxu0 }
 0x11f   :  { %v304_v0 = vmax.f32 %v268_v60, 0.0  ;;  %v316_v4 = vpack.c.bf16 %v306_v61, %v305_v1  ;;  %v289_v8 = vadd.f32 %v609_v62, %v521_v26 }
 0x120   :  { %v280_v2 = vpop.f32.mrf.mxu0 }
 0x121   :  { %v315_v3 = vpack.c.bf16 %v304_v0, %v303_v63  ;;  %v281_v6 = vadd.f32 %v521_v26, %v280_v2  ;;  %v309_v14 = vmax.f32 %v289_v8, 0.0 }
 0x122   :  { %v610_v5 = vpop.f32.mrf.mxu0 }
 0x123   :  { %v292_v7 = vadd.f32 %v610_v5, %v521_v26  ;;  %635 = vmatprep.mubr.bf16.mxu1 %v315_v3  ;;  %v307_v12 = vmax.f32 %v281_v6, 0.0 }
 0x124   :  { %v283_v9 = vpop.f32.mrf.mxu0  ;;  %636 = vmatmul.mubr.bf16.gmra.mxu1 %v316_v4 }
 0x125   :  { %v284_v10 = vadd.f32 %v521_v26, %v283_v9  ;;  %v310_v11 = vmax.f32 %v292_v7, 0.0 }
 0x127   :  { %v308_v13 = vmax.f32 %v284_v10, 0.0  ;;  %v318_v16 = vpack.c.bf16 %v310_v11, %v309_v14 }
 0x129   :  { %v317_v15 = vpack.c.bf16 %v308_v13, %v307_v12 }
 0x12b   :  { %639 = vmatprep.mubr.bf16.mxu1 %v317_v15 }
 0x12c   :  { %640 = vmatmul.mubr.bf16.gmra.mxu1 %v318_v16 }
 0x1d4   :  { %v629_v18 = vpop.f32.mrf.mxu1 }
 0x1d5   :  { %v433_v19 = vadd.f32 %v629_v18, %v538_v17 }
 0x1d6   :  { %v424_v20 = vpop.f32.mrf.mxu1 }
 0x1d7   :  { %489 = vst [vmem:[#allocation8 + $0x10] sm:$0xff] %v433_v19  ;;  %v425_v21 = vadd.f32 %v538_v17, %v424_v20 }
 0x1d8   :  { %v630_v22 = vpop.f32.mrf.mxu1 }
 0x1d9   :  { %487 = vst [vmem:[#allocation8] sm:$0xff] %v425_v21  ;;  %v436_v23 = vadd.f32 %v630_v22, %v538_v17 }
 0x1da   :  { %v427_v24 = vpop.f32.mrf.mxu1 }
 0x1db   :  { %490 = vst [vmem:[#allocation8 + $0x18] sm:$0xff] %v436_v23  ;;  %v428_v25 = vadd.f32 %v538_v17, %v427_v24 }
 0x1dc   :  { %v633_v26 = vpop.f32.mrf.mxu1 }
 0x1dd   :  { %488 = vst [vmem:[#allocation8 + $0x8] sm:$0xff] %v428_v25  ;;  %v449_v27 = vadd.f32 %v633_v26, %v538_v17 }
 0x1de   :  { %v440_v28 = vpop.f32.mrf.mxu1 }
 0x1df   :  { %493 = vst [vmem:[#allocation8 + $0x30] sm:$0xff] %v449_v27  ;;  %v441_v29 = vadd.f32 %v538_v17, %v440_v28 }
 0x1e0   :  { %v634_v30 = vpop.f32.mrf.mxu1 }
 0x1e1   :  { %491 = vst [vmem:[#allocation8 + $0x20] sm:$0xff] %v441_v29  ;;  %v452_v31 = vadd.f32 %v634_v30, %v538_v17 }
 0x1e2   :  { %v443_v32 = vpop.f32.mrf.mxu1 }
 0x1e3   :  { %494 = vst [vmem:[#allocation8 + $0x38] sm:$0xff] %v452_v31  ;;  %v444_v33 = vadd.f32 %v538_v17, %v443_v32 }
 0x1e4   :  { %v637_v34 = vpop.f32.mrf.mxu1 }
 0x1e5   :  { %492 = vst [vmem:[#allocation8 + $0x28] sm:$0xff] %v444_v33  ;;  %v465_v35 = vadd.f32 %v637_v34, %v538_v17 }
 0x1e6   :  { %v456_v36 = vpop.f32.mrf.mxu1 }
 0x1e7   :  { %497 = vst [vmem:[#allocation8 + $0x50] sm:$0xff] %v465_v35  ;;  %v457_v37 = vadd.f32 %v538_v17, %v456_v36 }
 0x1e8   :  { %v638_v38 = vpop.f32.mrf.mxu1 }
 0x1e9   :  { %495 = vst [vmem:[#allocation8 + $0x40] sm:$0xff] %v457_v37  ;;  %v468_v39 = vadd.f32 %v638_v38, %v538_v17 }
 0x1ea   :  { %v459_v40 = vpop.f32.mrf.mxu1 }
 0x1eb   :  { %498 = vst [vmem:[#allocation8 + $0x58] sm:$0xff] %v468_v39  ;;  %v460_v41 = vadd.f32 %v538_v17, %v459_v40 }
 0x1ec   :  { %v641_v42 = vpop.f32.mrf.mxu1 }
 0x1ed   :  { %496 = vst [vmem:[#allocation8 + $0x48] sm:$0xff] %v460_v41  ;;  %v481_v43 = vadd.f32 %v641_v42, %v538_v17 }
 0x1ee   :  { %v472_v44 = vpop.f32.mrf.mxu1 }
 0x1ef   :  { %501 = vst [vmem:[#allocation8 + $0x70] sm:$0xff] %v481_v43  ;;  %v473_v45 = vadd.f32 %v538_v17, %v472_v44 }
 0x1f0   :  { %v642_v46 = vpop.f32.mrf.mxu1 }
 0x1f1   :  { %499 = vst [vmem:[#allocation8 + $0x60] sm:$0xff] %v473_v45  ;;  %v484_v47 = vadd.f32 %v642_v46, %v538_v17 }
 0x1f2   :  { %v475_v48 = vpop.f32.mrf.mxu1 }
 0x1f3   :  { %502 = vst [vmem:[#allocation8 + $0x78] sm:$0xff] %v484_v47  ;;  %v476_v49 = vadd.f32 %v538_v17, %v475_v48 }
 0x1f5   :  { %500 = vst [vmem:[#allocation8 + $0x68] sm:$0xff] %v476_v49 }
 0x1f6   :  { %746 = shalt.err (!%p743_p5)
}
 0x1f7   :  { %s767_s12 = smov 128   ;;  %s768_s13 = smov 8  }
 0x1f8   :  { %514 = dma.vmem_to_hbm [thread:$0]  %s509_s10, 2048, %s822_s5, [#allocation4], %s767_s12, %s767_s12, %s768_s13  }
 0x1f9   :  { %759 = dma.done.wait [#allocation4], 2048  }
 0x1fa   :  { %760 = vsyncadd [#allocation4], 4294965248 }
 0x1fb   :  { %518 = vsyncpa [#allocation3], 1 }
 0x1fc   :  { %519 = vsyncpa [#allocation6], 1 }
 0x1fd   :  { %520 = vsyncpa [#allocation4], 1 }

</bundles_post_ra>
